<compile_context>
chip_gen: v6e
topology: v6e:2x2x1
jax: 0.10.0
libtpu: 0.0.40
codegen_flags: <defaults>
</compile_context>

<pallas_src>
import numpy as np
import jax
import jax.numpy as jnp
from jax import lax
from jax.experimental import pallas as pl
from jax.experimental.pallas import tpu as pltpu


def _vmem_budget_and_limit():
    """Generation-aware VMEM sizing.

    v5e / v6e have 128 MiB physical VMEM per TensorCore -> spend ~80 MiB on
    the pipelined working set (scoped limit 100 MiB).  v7x has 64 MiB per
    TensorCore -> stay at ~36 MiB working set / 48 MiB limit.  Falls back to
    the conservative (v7x) numbers if the hardware query is unavailable.
    """
    try:
        cap = int(pltpu.get_tpu_info().vmem_capacity_bytes)
    except Exception:
        cap = 64 * 1024 * 1024
    if cap >= 128 * 1024 * 1024:                      # v5e / v6e
        return 80 * 1024 * 1024, 100 * 1024 * 1024
    return 36 * 1024 * 1024, 48 * 1024 * 1024         # v7x (per TensorCore)


def _choose_class_block(n_cls, per_class_bytes, budget_bytes, sub):
    """Pick classes-per-grid-step.

    Preference order:
      1. no host-side padding (block divides n_cls) -- padding the big
         prefix/suffix arrays costs an extra full read+write of them;
      2. an even number of grid steps (keeps both v7x TensorCores busy);
      3. the largest block that fits the VMEM working-set budget (longer
         DMAs, fewer ~0.35 us/step fixed overheads).
    """
    c_max = max(sub, int(budget_bytes // per_class_bytes) // sub * sub)
    if n_cls <= c_max:
        # Everything fits in one step.  Use two equal, sublane-aligned,
        # pad-free steps when alignment allows (v7x megacore); otherwise a
        # single full-axis block (legal for any n_cls, no padding).
        half = n_cls // 2
        if n_cls % (2 * sub) == 0 and half >= sub:
            return half
        return n_cls
    # Largest sublane-aligned divisor of n_cls that fits the budget (no pad).
    for c in range(c_max, sub - 1, -sub):
        if n_cls % c == 0:
            return c
    # Fallback: pad to the smallest even step count whose block fits.
    steps = 2
    while True:
        c = pl.cdiv(pl.cdiv(n_cls, steps), sub) * sub
        if c <= c_max:
            return c
        steps += 2


def _make_end_kernel(*, d, n_ctx, suf_len, c_blk, mixin):
    lo = d                     # lane offset where ctx starts
    hi = (1 + n_ctx) * d       # lane offset where the suffix starts

    if not mixin:
        def kernel(prefix_ref, ctx_ref, *rest):
            # prefix_ref : (c_blk, d)
            # ctx_ref    : (c_blk, n_ctx*d)   shared ctx pre-tiled to c_blk,
            #                                 or per-class ctx block
            # suffix_ref : (c_blk, suf_len*d) present iff suf_len > 0
            # out_ref    : (c_blk, seq_len*d)
            if suf_len:
                suffix_ref, out_ref = rest
            else:
                (out_ref,) = rest
            out_ref[:, 0:lo] = prefix_ref[...]
            out_ref[:, lo:hi] = ctx_ref[...].astype(out_ref.dtype)
            if suf_len:
                out_ref[:, hi:] = suffix_ref[...]
        return kernel

    def kernel(gid_ref, prefix_ref, ctx_ref, *rest):
        # gid_ref    : (n_cls_padded,) int32 in SMEM (scalar-prefetched)
        # ctx_ref    : (n_groups, n_ctx*d), VMEM-resident group table
        if suf_len:
            suffix_ref, out_ref = rest
        else:
            (out_ref,) = rest
        out_ref[:, 0:lo] = prefix_ref[...]
        if suf_len:
            out_ref[:, hi:] = suffix_ref[...]
        base = pl.program_id(0) * c_blk

        def body(c, carry):
            g = gid_ref[base + c]
            out_ref[pl.ds(c, 1), pl.ds(lo, n_ctx * d)] = (
                ctx_ref[pl.ds(g, 1), :].astype(out_ref.dtype))
            return carry

        lax.fori_loop(0, c_blk, body, 0)
    return kernel


def coop_forward(ctx, token_prefix, token_suffix, *, csc):
    """prompts = cat([prefix, ctx, suffix], dim=1) (class_token_position='end').

    ctx          : (n_ctx, D)            if csc is False (generic context)
                   (n_cls, n_ctx, D)     if csc is True  (class-specific)
                   (n_groups, n_ctx, D)  if csc is a list/array of group ids
    token_prefix : (n_cls, 1, D)
    token_suffix : (n_cls, L - 1 - n_ctx, D)
    returns      : (n_cls, L, D)
    """
    n_cls, _, d = token_prefix.shape
    suf_len = token_suffix.shape[1]
    out_dtype = token_prefix.dtype
    itemsize = jnp.dtype(out_dtype).itemsize

    if csc is False:
        mode = "shared"
        n_ctx = ctx.shape[0]
    elif csc is True:
        mode = "per_class"
        n_ctx = ctx.shape[1]
    else:
        mode = "mixin"
        n_ctx = ctx.shape[1]
    mixin = mode == "mixin"
    seq_len = 1 + n_ctx + suf_len

    # Class axis rides the sublanes -> keep blocks sublane-tile aligned.
    sub = max(8, 32 // itemsize)

    budget, vmem_limit = _vmem_budget_and_limit()
    resident = 2 * ctx.shape[0] * n_ctx * d * itemsize if mixin else 0
    per_class = 4 * seq_len * d * itemsize        # double-buffered in + out
    c_blk = _choose_class_block(
        n_cls, per_class, max(budget - resident, per_class * sub), sub)

    n_pad = (-n_cls) % c_blk
    n_cls_p = n_cls + n_pad
    grid = (n_cls_p // c_blk,)

    # Flatten the token axis into lanes (contiguous HBM -> free reshapes).
    prefix2 = token_prefix.reshape(n_cls, d)
    suffix2 = token_suffix.reshape(n_cls, suf_len * d) if suf_len else None
    if n_pad:
        prefix2 = jnp.pad(prefix2, ((0, n_pad), (0, 0)))
        if suf_len:
            suffix2 = jnp.pad(suffix2, ((0, n_pad), (0, 0)))

    # Index maps.  With scalar prefetch (mixin) the group-id SMEM ref is
    # passed as an extra trailing positional arg to every index_map.
    if mixin:
        blk_map = lambda i, gid: (i, 0)
        pin_map = lambda i, gid: (0, 0)
    else:
        blk_map = lambda i: (i, 0)
        pin_map = lambda i: (0, 0)

    scalar_args = ()
    if mode == "shared":
        # Tile the shared ctx to one class block on the host (tiny, and the
        # constant-index BlockSpec keeps it resident -> DMA'd once), so the
        # kernel never materializes a (c_blk, n_ctx*d) broadcast in vregs.
        ctx_op = jnp.broadcast_to(ctx.reshape(1, n_ctx * d), (c_blk, n_ctx * d))
        ctx_spec = pl.BlockSpec((c_blk, n_ctx * d), pin_map)
    elif mode == "per_class":
        ctx_op = ctx.reshape(n_cls, n_ctx * d)
        if n_pad:
            ctx_op = jnp.pad(ctx_op, ((0, n_pad), (0, 0)))
        ctx_spec = pl.BlockSpec((c_blk, n_ctx * d), blk_map)
    else:  # mixin: full group table resident in VMEM + in-kernel gather
        gids = jnp.asarray(csc, dtype=jnp.int32).reshape(n_cls)
        if n_pad:
            gids = jnp.pad(gids, (0, n_pad))      # padded rows use group 0
        scalar_args = (gids,)
        ctx_op = ctx.reshape(ctx.shape[0], n_ctx * d)
        ctx_spec = pl.BlockSpec((ctx.shape[0], n_ctx * d), pin_map)

    in_specs = [pl.BlockSpec((c_blk, d), blk_map), ctx_spec]
    operands = [prefix2, ctx_op]
    if suf_len:                                   # guard suf_len == 0
        in_specs.append(pl.BlockSpec((c_blk, suf_len * d), blk_map))
        operands.append(suffix2)

    kernel = _make_end_kernel(d=d, n_ctx=n_ctx, suf_len=suf_len,
                              c_blk=c_blk, mixin=mixin)

    out = pl.pallas_call(
        kernel,
        out_shape=jax.ShapeDtypeStruct((n_cls_p, seq_len * d), out_dtype),
        grid_spec=pltpu.PrefetchScalarGridSpec(
            num_scalar_prefetch=1 if mixin else 0,
            grid=grid,
            in_specs=in_specs,
            out_specs=pl.BlockSpec((c_blk, seq_len * d), blk_map),
        ),
        compiler_params=pltpu.CompilerParams(
            dimension_semantics=("parallel",),
            vmem_limit_bytes=vmem_limit),
    )(*scalar_args, *operands)

    if n_pad:
        out = out[:n_cls]
    return out.reshape(n_cls, seq_len, d)


def _reference(ctx, token_prefix, token_suffix, csc):
    n_cls = token_prefix.shape[0]
    if csc is False:
        ctx3 = jnp.broadcast_to(ctx[None], (n_cls,) + ctx.shape)
    elif csc is True:
        ctx3 = ctx
    else:
        ctx3 = ctx[jnp.asarray(csc)]
    return jnp.concatenate([token_prefix, ctx3, token_suffix], axis=1)


if __name__ == "__main__":
    ctx_std = 0.0125
    keys = jax.random.split(jax.random.PRNGKey(0), 12)

    def run_case(name, kp, ks, kc, n_cls, n_ctx, d, seq_len, csc):
        suf_len = seq_len - 1 - n_ctx
        token_prefix = jax.random.normal(kp, (n_cls, 1, d), jnp.float32)
        token_suffix = jax.random.normal(ks, (n_cls, suf_len, d), jnp.float32)
        if csc is False:
            ctx = ctx_std * jax.random.normal(kc, (n_ctx, d), jnp.float32)
        elif csc is True:
            ctx = ctx_std * jax.random.normal(kc, (n_cls, n_ctx, d), jnp.float32)
        else:
            n_groups = int(np.max(np.asarray(csc))) + 1
            ctx = ctx_std * jax.random.normal(
                kc, (n_groups, n_ctx, d), jnp.float32)
        out = jax.block_until_ready(
            coop_forward(ctx, token_prefix, token_suffix, csc=csc))
        ref = _reference(ctx, token_prefix, token_suffix, csc)
        assert out.shape == (n_cls, seq_len, d), name
        assert bool(jnp.array_equal(out, ref)), name

    # csc=False (generic ctx), lane-aligned D, single full-axis grid step.
    run_case("generic", keys[0], keys[1], keys[2], 5, 4, 128, 16, False)
    # csc=True (class-specific contexts).
    run_case("csc", keys[3], keys[4], keys[5], 5, 4, 128, 16, True)
    # csc=list (mixin): scalar-prefetched group ids + in-kernel gather.
    run_case("mixin", keys[6], keys[7], keys[8], 5, 4, 128, 16, [0, 1, 0, 1, 0])
    # Multi-step grid (2 steps) with the shared ctx resident across steps.
    run_case("generic-2step", keys[9], keys[10], keys[11], 32, 4, 128, 16, False)
    # Mixin across 2 grid steps (exercises the block-base scalar indexing).
    run_case("mixin-2step", keys[0], keys[3], keys[6], 32, 4, 128, 16,
             [int(i % 3) for i in range(32)])
    # Sub-128 embedding width (lane-masked stores; correctness only).
    run_case("narrow-d", keys[1], keys[4], keys[7], 5, 4, 32, 16, False)

    print("KERNEL_OK")
</pallas_src>

<mosaic_0001>
module attributes {stable_mosaic.version = 11 : i64} {
  func.func @kernel(%arg0: i32, %arg1: memref<5x128xf32, #tpu.memory_space<vmem>>, %arg2: memref<5x512xf32, #tpu.memory_space<vmem>>, %arg3: memref<5x1408xf32, #tpu.memory_space<vmem>>, %arg4: memref<5x2048xf32, #tpu.memory_space<vmem>>) attributes {dimension_semantics = [#tpu.dimension_semantics<parallel>], iteration_bounds = array<i64: 1>, scalar_prefetch = 0 : i64, scratch_operands = 0 : i64, tpu.core_type = #tpu.core_type<tc>, window_params = [{transform_indices = @transform_0, window_bounds = array<i64: 5, 128>}, {pipeline_mode = #tpu.pipeline_mode<synchronous>, transform_indices = @transform_1, window_bounds = array<i64: 5, 512>}, {transform_indices = @transform_2, window_bounds = array<i64: 5, 1408>}, {transform_indices = @transform_3, window_bounds = array<i64: 5, 2048>}]} {
    %c0 = arith.constant 0 : index
    %c0_0 = arith.constant 0 : index
    %0 = vector.load %arg1[%c0, %c0_0] : memref<5x128xf32, #tpu.memory_space<vmem>>, vector<5x128xf32>
    %c0_1 = arith.constant 0 : index
    %c0_2 = arith.constant 0 : index
    %1 = vector.load %arg4[%c0_1, %c0_2] : memref<5x2048xf32, #tpu.memory_space<vmem>>, vector<5x128xf32>
    tpu.vector_store %arg4[%c0_1, %c0_2], %0 {strides = array<i32>} : memref<5x2048xf32, #tpu.memory_space<vmem>>, vector<5x128xf32>,
    %c0_3 = arith.constant 0 : index
    %c0_4 = arith.constant 0 : index
    %2 = vector.load %arg2[%c0_3, %c0_4] : memref<5x512xf32, #tpu.memory_space<vmem>>, vector<5x512xf32>
    %c0_5 = arith.constant 0 : index
    %c128 = arith.constant 128 : index
    %3 = vector.load %arg4[%c0_5, %c128] : memref<5x2048xf32, #tpu.memory_space<vmem>>, vector<5x512xf32>
    tpu.vector_store %arg4[%c0_5, %c128], %2 {strides = array<i32>} : memref<5x2048xf32, #tpu.memory_space<vmem>>, vector<5x512xf32>,
    %c0_6 = arith.constant 0 : index
    %c0_7 = arith.constant 0 : index
    %4 = vector.load %arg3[%c0_6, %c0_7] : memref<5x1408xf32, #tpu.memory_space<vmem>>, vector<5x1408xf32>
    %c0_8 = arith.constant 0 : index
    %c640 = arith.constant 640 : index
    %5 = vector.load %arg4[%c0_8, %c640] : memref<5x2048xf32, #tpu.memory_space<vmem>>, vector<5x1408xf32>
    tpu.vector_store %arg4[%c0_8, %c640], %4 {strides = array<i32>} : memref<5x2048xf32, #tpu.memory_space<vmem>>, vector<5x1408xf32>,
    return
  }
  func.func @transform_0(%arg0: i32) -> (i32, i32) {
    %c0_i32 = arith.constant 0 : i32
    %c0_i32_0 = arith.constant 0 : i32
    return %arg0, %c0_i32 : i32, i32
  }
  func.func @transform_1(%arg0: i32) -> (i32, i32) {
    %c0_i32 = arith.constant 0 : i32
    %c0_i32_0 = arith.constant 0 : i32
    %c0_i32_1 = arith.constant 0 : i32
    return %c0_i32, %c0_i32_0 : i32, i32
  }
  func.func @transform_2(%arg0: i32) -> (i32, i32) {
    %c0_i32 = arith.constant 0 : i32
    %c0_i32_0 = arith.constant 0 : i32
    return %arg0, %c0_i32 : i32, i32
  }
  func.func @transform_3(%arg0: i32) -> (i32, i32) {
    %c0_i32 = arith.constant 0 : i32
    %c0_i32_0 = arith.constant 0 : i32
    return %arg0, %c0_i32 : i32, i32
  }
}

</mosaic_0001>

<bundles_post_ra>
// kernel: tpu_custom_call.1
= control target key start
LH: loop header
LB: loop body
LE: loop exit
PB: predicated region body
PF: predicated region fallthrough
CT: control target
= control target key end

     0   :  { %8 = vsyncpa [#allocation3], 0  ;;  %s224_s0 = inlined_call_operand.hbm [shape: f32[5,128], index: 0, kind: input, shape index: {}]   ;;  %s225_s1 = inlined_call_operand.hbm [shape: f32[5,512], index: 1, kind: input, shape index: {}]   ;;  %s226_s2 = inlined_call_operand.hbm [shape: f32[5,1408], index: 2, kind: input, shape index: {}]   ;;  %s227_s3 = inlined_call_operand.hbm [shape: f32[5,2048], index: 3, kind: output, shape index: {}]  }
   0x1   :  { %9 = vsyncpa [#allocation6], 0 }
   0x2   :  { %10 = vsyncpa [#allocation4], 0  ;;  %s188_s12 = smov [#allocation5]   ;;  %s189_s14 = smov [#allocation2]  }
   0x3   :  { %s27_s13 = sshll.u32 %s188_s12, 4  ;;  %s17_s15 = sshll.u32 %s189_s14, 4  ;;  %s28_s13 = int_to_ptr.vmem [resolvable:$true] %s27_s13  ;;  %s18_s15 = int_to_ptr.vmem [resolvable:$true] %s17_s15 }
   0x4   :  { %s110_s16 = scalar_lea.vmem %s28_s13, 512  ;;  %p115_p1 = scmp.lt.s32.totalorder %s28_s13, %s28_s13 }
   0x5   :  { %p111_p0 = scmp.ne.s32.totalorder %s28_s13, %s110_s16  ;;  %p116_p2 = scmp.lt.s32.totalorder %s110_s16, %s110_s16 }
   0x7   :  { %p117_p3 = por %p116_p2, %p115_p1 }
   0x9   :  { %p118_p4 = pnand %p117_p3, %p111_p0 }
   0xb   :  { %121 = shalt.err (!%p118_p4)
}
   0xc   :  { %30 = dma.hbm_to_vmem [thread:$0]  %s225_s1, 512, %s28_s13, [#allocation6]  }
   0xd   :  { %s130_s19 = scalar_lea.vmem %s18_s15, 128  ;;  %p135_p6 = scmp.lt.s32.totalorder %s18_s15, %s18_s15 }
   0xe   :  { %p131_p5 = scmp.ne.s32.totalorder %s18_s15, %s130_s19  ;;  %p136_p7 = scmp.lt.s32.totalorder %s130_s19, %s130_s19 }
  0x10   :  { %p137_p8 = por %p136_p7, %p135_p6 }
  0x12   :  { %p138_p9 = pnand %p137_p8, %p131_p5 }
  0x14   :  { %141 = shalt.err (!%p138_p9)
}
  0x15   :  { %20 = dma.hbm_to_vmem [thread:$0]  %s224_s0, 128, %s18_s15, [#allocation3]  }
  0x16   :  { %s190_s22 = smov [#allocation7]  }
  0x17   :  { %s37_s23 = sshll.u32 %s190_s22, 4  ;;  %s38_s23 = int_to_ptr.vmem [resolvable:$true] %s37_s23 }
  0x18   :  { %s150_s24 = scalar_lea.vmem %s38_s23, 1408  ;;  %p155_p11 = scmp.lt.s32.totalorder %s38_s23, %s38_s23 }
  0x19   :  { %p151_p10 = scmp.ne.s32.totalorder %s38_s23, %s150_s24  ;;  %p156_p12 = scmp.lt.s32.totalorder %s150_s24, %s150_s24 }
  0x1b   :  { %p157_p13 = por %p156_p12, %p155_p11 }
  0x1d   :  { %p158_p0 = pnand %p157_p13, %p151_p10 }
  0x1f   :  { %161 = shalt.err (!%p158_p0)
}
  0x20   :  { %40 = dma.hbm_to_vmem [thread:$0]  %s226_s2, 1408, %s38_s23, [#allocation6]  }
  0x21   :  { %182 = dma.done.wait [#allocation3], 128  }
  0x22   :  { %183 = vsyncadd [#allocation3], 4294967168 }
  0x23   :  { %184 = dma.done.wait [#allocation6], 1920  }
  0x24   :  { %185 = vsyncadd [#allocation6], 4294965376  ;;  %s191_s26 = smov [#allocation8]   ;;  %v50_v0 = vld [vmem:[#allocation2] sm:$0x1f] }
  0x25   :  { %s88_s0 = sshll.u32 %s191_s26, 4  ;;  %v52_v1 = vld [vmem:[#allocation5] sm:$0x1f]  ;;  %v53_v2 = vld [vmem:[#allocation5 + $0x8] sm:$0x1f]  ;;  %s89_s0 = int_to_ptr.vmem [resolvable:$true] %s88_s0 }
  0x26   :  { %51 = vst [vmem:[#allocation8] sm:$0x1f] %v50_v0  ;;  %56 = vst [vmem:[#allocation8 + $0x8] sm:$0x1f] %v52_v1  ;;  %v54_v3 = vld [vmem:[#allocation5 + $0x10] sm:$0x1f]  ;;  %p167_p2 = scmp.lt.s32.totalorder %s89_s0, %s89_s0 }
  0x27   :  { %57 = vst [vmem:[#allocation8 + $0x10] sm:$0x1f] %v53_v2  ;;  %v55_v4 = vld [vmem:[#allocation5 + $0x18] sm:$0x1f]  ;;  %v60_v5 = vld [vmem:[#allocation7] sm:$0x1f] }
  0x28   :  { %58 = vst [vmem:[#allocation8 + $0x18] sm:$0x1f] %v54_v3  ;;  %59 = vst [vmem:[#allocation8 + $0x20] sm:$0x1f] %v55_v4  ;;  %v61_v6 = vld [vmem:[#allocation7 + $0x8] sm:$0x1f] }
  0x29   :  { %71 = vst [vmem:[#allocation8 + $0x28] sm:$0x1f] %v60_v5  ;;  %v62_v7 = vld [vmem:[#allocation7 + $0x10] sm:$0x1f]  ;;  %v63_v8 = vld [vmem:[#allocation7 + $0x18] sm:$0x1f] }
  0x2a   :  { %72 = vst [vmem:[#allocation8 + $0x30] sm:$0x1f] %v61_v6  ;;  %73 = vst [vmem:[#allocation8 + $0x38] sm:$0x1f] %v62_v7  ;;  %v64_v9 = vld [vmem:[#allocation7 + $0x20] sm:$0x1f] }
  0x2b   :  { %74 = vst [vmem:[#allocation8 + $0x40] sm:$0x1f] %v63_v8  ;;  %v65_v10 = vld [vmem:[#allocation7 + $0x28] sm:$0x1f]  ;;  %v66_v11 = vld [vmem:[#allocation7 + $0x30] sm:$0x1f] }
  0x2c   :  { %75 = vst [vmem:[#allocation8 + $0x48] sm:$0x1f] %v64_v9  ;;  %76 = vst [vmem:[#allocation8 + $0x50] sm:$0x1f] %v65_v10  ;;  %v67_v12 = vld [vmem:[#allocation7 + $0x38] sm:$0x1f] }
  0x2d   :  { %77 = vst [vmem:[#allocation8 + $0x58] sm:$0x1f] %v66_v11  ;;  %v68_v13 = vld [vmem:[#allocation7 + $0x40] sm:$0x1f]  ;;  %v69_v14 = vld [vmem:[#allocation7 + $0x48] sm:$0x1f] }
  0x2e   :  { %78 = vst [vmem:[#allocation8 + $0x60] sm:$0x1f] %v67_v12  ;;  %79 = vst [vmem:[#allocation8 + $0x68] sm:$0x1f] %v68_v13  ;;  %v70_v15 = vld [vmem:[#allocation7 + $0x50] sm:$0x1f] }
  0x2f   :  { %80 = vst [vmem:[#allocation8 + $0x70] sm:$0x1f] %v69_v14  ;;  %81 = vst [vmem:[#allocation8 + $0x78] sm:$0x1f] %v70_v15  ;;  %s162_s2 = scalar_lea.vmem %s89_s0, 2048 }
  0x30   :  { %p163_p1 = scmp.ne.s32.totalorder %s89_s0, %s162_s2  ;;  %p168_p3 = scmp.lt.s32.totalorder %s162_s2, %s162_s2 }
  0x32   :  { %p169_p4 = por %p168_p3, %p167_p2 }
  0x34   :  { %p170_p5 = pnand %p169_p4, %p163_p1 }
  0x36   :  { %173 = shalt.err (!%p170_p5)
}
  0x37   :  { %91 = dma.vmem_to_hbm [thread:$0]  %s89_s0, 2048, %s227_s3, [#allocation4]  }
  0x38   :  { %186 = dma.done.wait [#allocation4], 2048  }
  0x39   :  { %187 = vsyncadd [#allocation4], 4294965248 }
  0x3a   :  { %95 = vsyncpa [#allocation3], 1 }
  0x3b   :  { %96 = vsyncpa [#allocation6], 1 }
  0x3c   :  { %97 = vsyncpa [#allocation4], 1 }

</bundles_post_ra>
